<compile_context>
chip_gen: v7x
topology: tpu7x:2x2x1
jax: 0.10.0
libtpu: 0.0.40
codegen_flags: <defaults>
</compile_context>

<pallas_src>
import jax
import jax.numpy as jnp
from jax.experimental import pallas as pl
from jax.experimental.pallas import tpu as pltpu


def head_kernel(x_q_ref, x_kv_ref, wq_ref, wk_ref, wv_ref,
                bq_ref, bk_ref, bv_ref, o_ref,
                k_cache, v_cache, q_scr, m_scr, l_scr, acc_scr):
    """One (batch, q-tile, kv-tile) grid step of causal single-head attention."""
    TQ = x_q_ref.shape[0]          # query-tile rows
    TK = x_kv_ref.shape[0]         # kv-tile rows
    H = o_ref.shape[-1]            # head size
    scale = float(H) ** -0.5       # k.shape[-1] ** (-0.5)

    qi = pl.program_id(1)
    kvi = pl.program_id(2)
    n_kv = pl.num_programs(2)
    q0 = qi * TQ                   # global first query row of this tile
    kv0 = kvi * TK                 # global first key column of this tile

    # ---- K/V projection: exactly once per (batch, kv-tile), cached in VMEM.
    @pl.when(qi == 0)
    def _():
        xkv = x_kv_ref[...]                                   # (TK, E) bf16
        k = jnp.dot(xkv, wk_ref[...],
                    preferred_element_type=jnp.float32) + bk_ref[...]
        v = jnp.dot(xkv, wv_ref[...],
                    preferred_element_type=jnp.float32) + bv_ref[...]
        k_cache[kvi] = k.astype(k_cache.dtype)
        v_cache[kvi] = v.astype(v_cache.dtype)

    # ---- Q projection + online-softmax state init: once per q tile.
    @pl.when(kvi == 0)
    def _():
        q = jnp.dot(x_q_ref[...], wq_ref[...],
                    preferred_element_type=jnp.float32) + bq_ref[...]
        q_scr[...] = (q * scale).astype(q_scr.dtype)          # scale folded in
        m_scr[...] = jnp.full_like(m_scr, -jnp.inf)
        l_scr[...] = jnp.zeros_like(l_scr)
        acc_scr[...] = jnp.zeros_like(acc_scr)

    def attend(apply_mask):
        k = k_cache[kvi]                                      # (TK, H) bf16
        v = v_cache[kvi]                                      # (TK, H) bf16
        # Scores (TQ, TK): contract last dims (no explicit k transpose),
        # bf16 operands, f32 MXU accumulation.
        s = jax.lax.dot_general(
            q_scr[...], k,
            dimension_numbers=(((1,), (1,)), ((), ())),
            preferred_element_type=jnp.float32)
        if apply_mask:
            # single (TQ,TK) iota vs a (TQ,1) row limit: col <= row
            col = jax.lax.broadcasted_iota(jnp.int32, (TQ, TK), 1)
            lim = (q0 - kv0) + jax.lax.broadcasted_iota(jnp.int32, (TQ, 1), 0)
            s = jnp.where(col <= lim, s, -jnp.inf)
        m_prev = m_scr[...]
        m_new = jnp.maximum(m_prev, jnp.max(s, axis=-1, keepdims=True))
        alpha = jnp.exp(m_prev - m_new)
        p = jnp.exp(s - m_new)
        l_scr[...] = alpha * l_scr[...] + jnp.sum(p, axis=-1, keepdims=True)
        acc_scr[...] = alpha * acc_scr[...] + jnp.dot(
            p.astype(v.dtype), v, preferred_element_type=jnp.float32)
        m_scr[...] = m_new

    # Causal block classification (tile-level skip; mask only on the diagonal).
    has_valid_col = kv0 <= q0 + TQ - 1          # not fully above the diagonal
    fully_below = kv0 + TK - 1 <= q0            # all cols <= all rows: no mask

    @pl.when(jnp.logical_and(has_valid_col, fully_below))
    def _():
        attend(False)

    @pl.when(jnp.logical_and(has_valid_col, jnp.logical_not(fully_below)))
    def _():
        attend(True)

    # ---- Finalize: normalize and write the output tile once per q tile.
    @pl.when(kvi == n_kv - 1)
    def _():
        o_ref[...] = (acc_scr[...] * pl.reciprocal(l_scr[...], approx=True)
                      ).astype(o_ref.dtype)


def head_forward(x, wq, wk, wv, bq, bk, bv, *, q_tile=128, kv_tile=512):
    """x: (B, S, E); wq/wk/wv: (E, H); bq/bk/bv: (1, H). Returns (B, S, H)."""
    B, S, E = x.shape
    H = wq.shape[1]

    TQ = min(q_tile, S)
    TK = min(kv_tile, S)
    assert S % TQ == 0 and S % TK == 0, "sequence length must divide the tiles"
    n_q = S // TQ
    n_kv = S // TK

    # bf16 operands for the MXU (f32 accumulation stays inside the kernel);
    # halves x HBM->VMEM bytes.  Biases stay f32 (added post-accumulation).
    xb = x.astype(jnp.bfloat16)
    wqb = wq.astype(jnp.bfloat16)
    wkb = wk.astype(jnp.bfloat16)
    wvb = wv.astype(jnp.bfloat16)

    # x for the KV-projection pass is only needed while qi == 0; afterwards the
    # index map collapses to block 0 so the pipeline skips the redundant DMA.
    def x_kv_index(b, qi, kv):
        return (b, jnp.where(qi == 0, kv, 0), 0)

    return pl.pallas_call(
        head_kernel,
        out_shape=jax.ShapeDtypeStruct((B, S, H), jnp.float32),
        grid_spec=pltpu.PrefetchScalarGridSpec(
            num_scalar_prefetch=0,
            grid=(B, n_q, n_kv),
            in_specs=[
                # x, query-tile view (batch dim squeezed out of kernel ref)
                pl.BlockSpec((pl.Squeezed(), TQ, E), lambda b, qi, kv: (b, qi, 0)),
                # x, kv-tile view (only consumed while qi == 0)
                pl.BlockSpec((pl.Squeezed(), TK, E), x_kv_index),
                pl.BlockSpec((E, H), lambda b, qi, kv: (0, 0)),   # Wq
                pl.BlockSpec((E, H), lambda b, qi, kv: (0, 0)),   # Wk
                pl.BlockSpec((E, H), lambda b, qi, kv: (0, 0)),   # Wv
                pl.BlockSpec((1, H), lambda b, qi, kv: (0, 0)),   # bq
                pl.BlockSpec((1, H), lambda b, qi, kv: (0, 0)),   # bk
                pl.BlockSpec((1, H), lambda b, qi, kv: (0, 0)),   # bv
            ],
            out_specs=pl.BlockSpec((pl.Squeezed(), TQ, H),
                                   lambda b, qi, kv: (b, qi, 0)),
            scratch_shapes=[
                pltpu.VMEM((n_kv, TK, H), jnp.bfloat16),   # K cache (per batch)
                pltpu.VMEM((n_kv, TK, H), jnp.bfloat16),   # V cache (per batch)
                pltpu.VMEM((TQ, H), jnp.bfloat16),         # scaled Q tile
                pltpu.VMEM((TQ, 1), jnp.float32),          # running max m
                pltpu.VMEM((TQ, 1), jnp.float32),          # running sum l
                pltpu.VMEM((TQ, H), jnp.float32),          # output accumulator
            ],
        ),
        compiler_params=pltpu.CompilerParams(
            # batch parallel (v7x 2-TC sharding); q/kv arbitrary so the KV
            # cache and online-softmax scratch legally carry across steps.
            dimension_semantics=("parallel", "arbitrary", "arbitrary"),
        ),
    )(xb, xb, wqb, wkb, wvb, bq, bk, bv)


def reference_forward(x, wq, wk, wv, bq, bk, bv):
    """Pure-JAX (f32) reference matching the PyTorch forward."""
    q = x @ wq + bq
    k = x @ wk + bk
    v = x @ wv + bv
    s = (q @ jnp.swapaxes(k, -2, -1)) * (k.shape[-1] ** -0.5)
    sl = x.shape[1]
    mask = jnp.tril(jnp.ones((sl, sl), dtype=bool))
    s = jnp.where(mask, s, -jnp.inf)
    p = jax.nn.softmax(s, axis=-1)
    return p @ v


if __name__ == "__main__":
    # Small shapes consistent with the module.
    batch, seq, embed_size, head_size = 2, 8, 32, 16
    context = seq        # tril[:SL, :SL] with SL == context
    bias = True          # nn.Linear(..., bias=bias)
    dropout = 0.1        # defined but unused in forward()

    key = jax.random.PRNGKey(0)
    kx, kq, kk, kv, kbq, kbk, kbv = jax.random.split(key, 7)

    x = jax.random.normal(kx, (batch, seq, embed_size), dtype=jnp.float32)

    # PyTorch Linear weight is (H, E); we store W.T = (E, H).
    wq = jax.random.normal(kq, (embed_size, head_size), dtype=jnp.float32) * 0.1
    wk = jax.random.normal(kk, (embed_size, head_size), dtype=jnp.float32) * 0.1
    wv = jax.random.normal(kv, (embed_size, head_size), dtype=jnp.float32) * 0.1
    bq = jax.random.normal(kbq, (1, head_size), dtype=jnp.float32) * 0.1
    bk = jax.random.normal(kbk, (1, head_size), dtype=jnp.float32) * 0.1
    bv = jax.random.normal(kbv, (1, head_size), dtype=jnp.float32) * 0.1

    out = head_forward(x, wq, wk, wv, bq, bk, bv)
    out = jax.block_until_ready(out)

    ref = reference_forward(x, wq, wk, wv, bq, bk, bv)
    assert out.shape == (batch, seq, head_size)
    # bf16 MXU operands (f32 accumulation) + approx reciprocal loosen the
    # original 1e-5 tolerance slightly.
    assert jnp.allclose(out, ref, atol=5e-2, rtol=5e-2), (
        float(jnp.max(jnp.abs(out - ref))))

    print("KERNEL_OK")
</pallas_src>

<mosaic_0001>
module attributes {stable_mosaic.version = 11 : i64} {
  func.func @head_kernel(%arg0: i32, %arg1: i32, %arg2: i32, %arg3: memref<1x8x32xbf16, #tpu.memory_space<vmem>>, %arg4: memref<1x8x32xbf16, #tpu.memory_space<vmem>>, %arg5: memref<32x16xbf16, #tpu.memory_space<vmem>>, %arg6: memref<32x16xbf16, #tpu.memory_space<vmem>>, %arg7: memref<32x16xbf16, #tpu.memory_space<vmem>>, %arg8: memref<1x16xf32, #tpu.memory_space<vmem>>, %arg9: memref<1x16xf32, #tpu.memory_space<vmem>>, %arg10: memref<1x16xf32, #tpu.memory_space<vmem>>, %arg11: memref<1x8x16xf32, #tpu.memory_space<vmem>>, %arg12: memref<1x8x16xbf16, #tpu.memory_space<vmem>>, %arg13: memref<1x8x16xbf16, #tpu.memory_space<vmem>>, %arg14: memref<8x16xbf16, #tpu.memory_space<vmem>>, %arg15: memref<8x1xf32, #tpu.memory_space<vmem>>, %arg16: memref<8x1xf32, #tpu.memory_space<vmem>>, %arg17: memref<8x16xf32, #tpu.memory_space<vmem>>) attributes {dimension_semantics = [#tpu.dimension_semantics<parallel>, #tpu.dimension_semantics<arbitrary>, #tpu.dimension_semantics<arbitrary>], iteration_bounds = array<i64: 2, 1, 1>, scalar_prefetch = 0 : i64, scratch_operands = 6 : i64, tpu.core_type = #tpu.core_type<tc>, window_params = [{transform_indices = @transform_0, window_bounds = array<i64: 1, 8, 32>}, {transform_indices = @transform_1, window_bounds = array<i64: 1, 8, 32>}, {pipeline_mode = #tpu.pipeline_mode<synchronous>, transform_indices = @transform_2, window_bounds = array<i64: 32, 16>}, {pipeline_mode = #tpu.pipeline_mode<synchronous>, transform_indices = @transform_3, window_bounds = array<i64: 32, 16>}, {pipeline_mode = #tpu.pipeline_mode<synchronous>, transform_indices = @transform_4, window_bounds = array<i64: 32, 16>}, {pipeline_mode = #tpu.pipeline_mode<synchronous>, transform_indices = @transform_5, window_bounds = array<i64: 1, 16>}, {pipeline_mode = #tpu.pipeline_mode<synchronous>, transform_indices = @transform_6, window_bounds = array<i64: 1, 16>}, {pipeline_mode = #tpu.pipeline_mode<synchronous>, transform_indices = @transform_7, window_bounds = array<i64: 1, 16>}, {transform_indices = @transform_8, window_bounds = array<i64: 1, 8, 16>}]} {
    %c8_i32 = arith.constant 8 : i32
    %0 = arith.muli %arg1, %c8_i32 : i32
    %c8_i32_0 = arith.constant 8 : i32
    %1 = arith.muli %arg2, %c8_i32_0 : i32
    %c0_i32 = arith.constant 0 : i32
    %2 = arith.cmpi eq, %arg1, %c0_i32 : i32
    %3 = arith.extui %2 : i1 to i32
    %c0_i32_1 = arith.constant 0 : i32
    %4 = arith.cmpi ne, %3, %c0_i32_1 : i32
    scf.if %4 {
      %c0 = arith.constant 0 : index
      %c0_11 = arith.constant 0 : index
      %c0_12 = arith.constant 0 : index
      %24 = vector.load %arg4[%c0, %c0_11, %c0_12] : memref<1x8x32xbf16, #tpu.memory_space<vmem>>, vector<1x8x32xbf16>
      %25 = vector.shape_cast %24 : vector<1x8x32xbf16> to vector<8x32xbf16>
      %c0_13 = arith.constant 0 : index
      %c0_14 = arith.constant 0 : index
      %26 = vector.load %arg6[%c0_13, %c0_14] : memref<32x16xbf16, #tpu.memory_space<vmem>>, vector<32x16xbf16>
      %cst = arith.constant dense<0.000000e+00> : vector<8x16xf32>
      %27 = tpu.matmul %25, %26, %cst {dimension_numbers = #tpu.dot_dimension_numbers<[1], [0], [0], [1], [0, 0, 1, 1], [], []>} : vector<8x32xbf16>, vector<32x16xbf16>, vector<8x16xf32> -> vector<8x16xf32>
      %c0_15 = arith.constant 0 : index
      %c0_16 = arith.constant 0 : index
      %28 = vector.load %arg9[%c0_15, %c0_16] : memref<1x16xf32, #tpu.memory_space<vmem>>, vector<1x16xf32>
      %29 = vector.broadcast %28 : vector<1x16xf32> to vector<8x16xf32>
      %30 = arith.addf %27, %29 : vector<8x16xf32>
      %c0_17 = arith.constant 0 : index
      %c0_18 = arith.constant 0 : index
      %31 = vector.load %arg7[%c0_17, %c0_18] : memref<32x16xbf16, #tpu.memory_space<vmem>>, vector<32x16xbf16>
      %cst_19 = arith.constant dense<0.000000e+00> : vector<8x16xf32>
      %32 = tpu.matmul %25, %31, %cst_19 {dimension_numbers = #tpu.dot_dimension_numbers<[1], [0], [0], [1], [0, 0, 1, 1], [], []>} : vector<8x32xbf16>, vector<32x16xbf16>, vector<8x16xf32> -> vector<8x16xf32>
      %c0_20 = arith.constant 0 : index
      %c0_21 = arith.constant 0 : index
      %33 = vector.load %arg10[%c0_20, %c0_21] : memref<1x16xf32, #tpu.memory_space<vmem>>, vector<1x16xf32>
      %34 = vector.broadcast %33 : vector<1x16xf32> to vector<8x16xf32>
      %35 = arith.addf %32, %34 : vector<8x16xf32>
      %36 = arith.truncf %30 : vector<8x16xf32> to vector<8x16xbf16>
      %37 = arith.index_cast %arg2 : i32 to index
      %c0_22 = arith.constant 0 : index
      %c0_23 = arith.constant 0 : index
      %38 = vector.load %arg12[%37, %c0_22, %c0_23] : memref<1x8x16xbf16, #tpu.memory_space<vmem>>, vector<1x8x16xbf16>
      %39 = vector.shape_cast %38 : vector<1x8x16xbf16> to vector<8x16xbf16>
      %40 = vector.shape_cast %36 : vector<8x16xbf16> to vector<1x8x16xbf16>
      tpu.vector_store %arg12[%37, %c0_22, %c0_23], %40 {strides = array<i32>} : memref<1x8x16xbf16, #tpu.memory_space<vmem>>, vector<1x8x16xbf16>,
      %41 = arith.truncf %35 : vector<8x16xf32> to vector<8x16xbf16>
      %42 = arith.index_cast %arg2 : i32 to index
      %c0_24 = arith.constant 0 : index
      %c0_25 = arith.constant 0 : index
      %43 = vector.load %arg13[%42, %c0_24, %c0_25] : memref<1x8x16xbf16, #tpu.memory_space<vmem>>, vector<1x8x16xbf16>
      %44 = vector.shape_cast %43 : vector<1x8x16xbf16> to vector<8x16xbf16>
      %45 = vector.shape_cast %41 : vector<8x16xbf16> to vector<1x8x16xbf16>
      tpu.vector_store %arg13[%42, %c0_24, %c0_25], %45 {strides = array<i32>} : memref<1x8x16xbf16, #tpu.memory_space<vmem>>, vector<1x8x16xbf16>,
    } else {
    }
    %c0_i32_2 = arith.constant 0 : i32
    %5 = arith.cmpi eq, %arg2, %c0_i32_2 : i32
    %6 = arith.extui %5 : i1 to i32
    %c0_i32_3 = arith.constant 0 : i32
    %7 = arith.cmpi ne, %6, %c0_i32_3 : i32
    scf.if %7 {
      %c0 = arith.constant 0 : index
      %c0_11 = arith.constant 0 : index
      %c0_12 = arith.constant 0 : index
      %24 = vector.load %arg3[%c0, %c0_11, %c0_12] : memref<1x8x32xbf16, #tpu.memory_space<vmem>>, vector<1x8x32xbf16>
      %25 = vector.shape_cast %24 : vector<1x8x32xbf16> to vector<8x32xbf16>
      %c0_13 = arith.constant 0 : index
      %c0_14 = arith.constant 0 : index
      %26 = vector.load %arg5[%c0_13, %c0_14] : memref<32x16xbf16, #tpu.memory_space<vmem>>, vector<32x16xbf16>
      %cst = arith.constant dense<0.000000e+00> : vector<8x16xf32>
      %27 = tpu.matmul %25, %26, %cst {dimension_numbers = #tpu.dot_dimension_numbers<[1], [0], [0], [1], [0, 0, 1, 1], [], []>} : vector<8x32xbf16>, vector<32x16xbf16>, vector<8x16xf32> -> vector<8x16xf32>
      %c0_15 = arith.constant 0 : index
      %c0_16 = arith.constant 0 : index
      %28 = vector.load %arg8[%c0_15, %c0_16] : memref<1x16xf32, #tpu.memory_space<vmem>>, vector<1x16xf32>
      %29 = vector.broadcast %28 : vector<1x16xf32> to vector<8x16xf32>
      %30 = arith.addf %27, %29 : vector<8x16xf32>
      %cst_17 = arith.constant 2.500000e-01 : f32
      %31 = vector.broadcast %cst_17 : f32 to vector<8x16xf32>
      %32 = arith.mulf %30, %31 : vector<8x16xf32>
      %33 = arith.truncf %32 : vector<8x16xf32> to vector<8x16xbf16>
      %c0_18 = arith.constant 0 : index
      %c0_19 = arith.constant 0 : index
      %34 = vector.load %arg14[%c0_18, %c0_19] : memref<8x16xbf16, #tpu.memory_space<vmem>>, vector<8x16xbf16>
      tpu.vector_store %arg14[%c0_18, %c0_19], %33 {strides = array<i32>} : memref<8x16xbf16, #tpu.memory_space<vmem>>, vector<8x16xbf16>,
      %cst_20 = arith.constant 0xFF800000 : f32
      %35 = vector.broadcast %cst_20 : f32 to vector<8x1xf32>
      %c0_21 = arith.constant 0 : index
      %c0_22 = arith.constant 0 : index
      %36 = vector.load %arg15[%c0_21, %c0_22] : memref<8x1xf32, #tpu.memory_space<vmem>>, vector<8x1xf32>
      tpu.vector_store %arg15[%c0_21, %c0_22], %35 {strides = array<i32>} : memref<8x1xf32, #tpu.memory_space<vmem>>, vector<8x1xf32>,
      %cst_23 = arith.constant 0.000000e+00 : f32
      %37 = vector.broadcast %cst_23 : f32 to vector<8x1xf32>
      %c0_24 = arith.constant 0 : index
      %c0_25 = arith.constant 0 : index
      %38 = vector.load %arg16[%c0_24, %c0_25] : memref<8x1xf32, #tpu.memory_space<vmem>>, vector<8x1xf32>
      tpu.vector_store %arg16[%c0_24, %c0_25], %37 {strides = array<i32>} : memref<8x1xf32, #tpu.memory_space<vmem>>, vector<8x1xf32>,
      %cst_26 = arith.constant 0.000000e+00 : f32
      %39 = vector.broadcast %cst_26 : f32 to vector<8x16xf32>
      %c0_27 = arith.constant 0 : index
      %c0_28 = arith.constant 0 : index
      %40 = vector.load %arg17[%c0_27, %c0_28] : memref<8x16xf32, #tpu.memory_space<vmem>>, vector<8x16xf32>
      tpu.vector_store %arg17[%c0_27, %c0_28], %39 {strides = array<i32>} : memref<8x16xf32, #tpu.memory_space<vmem>>, vector<8x16xf32>,
    } else {
    }
    %c8_i32_4 = arith.constant 8 : i32
    %8 = arith.addi %0, %c8_i32_4 : i32
    %c1_i32 = arith.constant 1 : i32
    %9 = arith.subi %8, %c1_i32 : i32
    %10 = arith.cmpi sle, %1, %9 : i32
    %c8_i32_5 = arith.constant 8 : i32
    %11 = arith.addi %1, %c8_i32_5 : i32
    %c1_i32_6 = arith.constant 1 : i32
    %12 = arith.subi %11, %c1_i32_6 : i32
    %13 = arith.cmpi sle, %12, %0 : i32
    %14 = arith.andi %10, %13 : i1
    %15 = arith.extui %14 : i1 to i32
    %c0_i32_7 = arith.constant 0 : i32
    %16 = arith.cmpi ne, %15, %c0_i32_7 : i32
    scf.if %16 {
      %24 = arith.index_cast %arg2 : i32 to index
      %c0 = arith.constant 0 : index
      %c0_11 = arith.constant 0 : index
      %25 = vector.load %arg12[%24, %c0, %c0_11] : memref<1x8x16xbf16, #tpu.memory_space<vmem>>, vector<1x8x16xbf16>
      %26 = vector.shape_cast %25 : vector<1x8x16xbf16> to vector<8x16xbf16>
      %27 = arith.index_cast %arg2 : i32 to index
      %c0_12 = arith.constant 0 : index
      %c0_13 = arith.constant 0 : index
      %28 = vector.load %arg13[%27, %c0_12, %c0_13] : memref<1x8x16xbf16, #tpu.memory_space<vmem>>, vector<1x8x16xbf16>
      %29 = vector.shape_cast %28 : vector<1x8x16xbf16> to vector<8x16xbf16>
      %c0_14 = arith.constant 0 : index
      %c0_15 = arith.constant 0 : index
      %30 = vector.load %arg14[%c0_14, %c0_15] : memref<8x16xbf16, #tpu.memory_space<vmem>>, vector<8x16xbf16>
      %cst = arith.constant dense<0.000000e+00> : vector<8x8xf32>
      %31 = tpu.matmul %30, %26, %cst {dimension_numbers = #tpu.dot_dimension_numbers<[1], [1], [0], [0], [0, 0, 1, 0], [], []>} : vector<8x16xbf16>, vector<8x16xbf16>, vector<8x8xf32> -> vector<8x8xf32>
      %c0_16 = arith.constant 0 : index
      %c0_17 = arith.constant 0 : index
      %32 = vector.load %arg15[%c0_16, %c0_17] : memref<8x1xf32, #tpu.memory_space<vmem>>, vector<8x1xf32>
      %cst_18 = arith.constant dense<0xFF800000> : vector<8xf32>
      %33 = vector.multi_reduction <maximumf>, %31, %cst_18 [1] : vector<8x8xf32> to vector<8xf32>
      %34 = vector.shape_cast %33 : vector<8xf32> to vector<8x1xf32>
      %35 = arith.maximumf %32, %34 : vector<8x1xf32>
      %36 = arith.subf %32, %35 : vector<8x1xf32>
      %37 = math.exp %36 : vector<8x1xf32>
      %38 = vector.broadcast %35 : vector<8x1xf32> to vector<8x8xf32>
      %39 = arith.subf %31, %38 : vector<8x8xf32>
      %40 = math.exp %39 : vector<8x8xf32>
      %c0_19 = arith.constant 0 : index
      %c0_20 = arith.constant 0 : index
      %41 = vector.load %arg16[%c0_19, %c0_20] : memref<8x1xf32, #tpu.memory_space<vmem>>, vector<8x1xf32>
      %42 = arith.mulf %37, %41 : vector<8x1xf32>
      %cst_21 = arith.constant dense<0.000000e+00> : vector<8xf32>
      %43 = vector.multi_reduction <add>, %40, %cst_21 [1] : vector<8x8xf32> to vector<8xf32>
      %44 = vector.shape_cast %43 : vector<8xf32> to vector<8x1xf32>
      %45 = arith.addf %42, %44 : vector<8x1xf32>
      %c0_22 = arith.constant 0 : index
      %c0_23 = arith.constant 0 : index
      %46 = vector.load %arg16[%c0_22, %c0_23] : memref<8x1xf32, #tpu.memory_space<vmem>>, vector<8x1xf32>
      tpu.vector_store %arg16[%c0_22, %c0_23], %45 {strides = array<i32>} : memref<8x1xf32, #tpu.memory_space<vmem>>, vector<8x1xf32>,
      %c0_24 = arith.constant 0 : index
      %c0_25 = arith.constant 0 : index
      %47 = vector.load %arg17[%c0_24, %c0_25] : memref<8x16xf32, #tpu.memory_space<vmem>>, vector<8x16xf32>
      %48 = vector.broadcast %37 : vector<8x1xf32> to vector<8x16xf32>
      %49 = arith.mulf %48, %47 : vector<8x16xf32>
      %50 = arith.truncf %40 : vector<8x8xf32> to vector<8x8xbf16>
      %cst_26 = arith.constant dense<0.000000e+00> : vector<8x16xf32>
      %51 = tpu.matmul %50, %29, %cst_26 {dimension_numbers = #tpu.dot_dimension_numbers<[1], [0], [0], [1], [0, 0, 1, 1], [], []>} : vector<8x8xbf16>, vector<8x16xbf16>, vector<8x16xf32> -> vector<8x16xf32>
      %52 = arith.addf %49, %51 : vector<8x16xf32>
      %c0_27 = arith.constant 0 : index
      %c0_28 = arith.constant 0 : index
      %53 = vector.load %arg17[%c0_27, %c0_28] : memref<8x16xf32, #tpu.memory_space<vmem>>, vector<8x16xf32>
      tpu.vector_store %arg17[%c0_27, %c0_28], %52 {strides = array<i32>} : memref<8x16xf32, #tpu.memory_space<vmem>>, vector<8x16xf32>,
      %c0_29 = arith.constant 0 : index
      %c0_30 = arith.constant 0 : index
      %54 = vector.load %arg15[%c0_29, %c0_30] : memref<8x1xf32, #tpu.memory_space<vmem>>, vector<8x1xf32>
      tpu.vector_store %arg15[%c0_29, %c0_30], %35 {strides = array<i32>} : memref<8x1xf32, #tpu.memory_space<vmem>>, vector<8x1xf32>,
    } else {
    }
    %true = arith.constant true
    %17 = arith.xori %13, %true : i1
    %18 = arith.andi %10, %17 : i1
    %19 = arith.extui %18 : i1 to i32
    %c0_i32_8 = arith.constant 0 : i32
    %20 = arith.cmpi ne, %19, %c0_i32_8 : i32
    scf.if %20 {
      %24 = arith.index_cast %arg2 : i32 to index
      %c0 = arith.constant 0 : index
      %c0_11 = arith.constant 0 : index
      %25 = vector.load %arg12[%24, %c0, %c0_11] : memref<1x8x16xbf16, #tpu.memory_space<vmem>>, vector<1x8x16xbf16>
      %26 = vector.shape_cast %25 : vector<1x8x16xbf16> to vector<8x16xbf16>
      %27 = arith.index_cast %arg2 : i32 to index
      %c0_12 = arith.constant 0 : index
      %c0_13 = arith.constant 0 : index
      %28 = vector.load %arg13[%27, %c0_12, %c0_13] : memref<1x8x16xbf16, #tpu.memory_space<vmem>>, vector<1x8x16xbf16>
      %29 = vector.shape_cast %28 : vector<1x8x16xbf16> to vector<8x16xbf16>
      %c0_14 = arith.constant 0 : index
      %c0_15 = arith.constant 0 : index
      %30 = vector.load %arg14[%c0_14, %c0_15] : memref<8x16xbf16, #tpu.memory_space<vmem>>, vector<8x16xbf16>
      %cst = arith.constant dense<0.000000e+00> : vector<8x8xf32>
      %31 = tpu.matmul %30, %26, %cst {dimension_numbers = #tpu.dot_dimension_numbers<[1], [1], [0], [0], [0, 0, 1, 0], [], []>} : vector<8x16xbf16>, vector<8x16xbf16>, vector<8x8xf32> -> vector<8x8xf32>
      %32 = tpu.iota {dimensions = array<i32: 1>} : vector<8x8xi32>
      %33 = arith.subi %0, %1 : i32
      %34 = tpu.iota {dimensions = array<i32: 0>} : vector<8x1xi32>
      %35 = vector.broadcast %33 : i32 to vector<8x1xi32>
      %36 = arith.addi %35, %34 : vector<8x1xi32>
      %37 = vector.broadcast %36 : vector<8x1xi32> to vector<8x8xi32>
      %38 = arith.cmpi sle, %32, %37 : vector<8x8xi32>
      %cst_16 = arith.constant 0xFF800000 : f32
      %39 = vector.broadcast %cst_16 : f32 to vector<8x8xf32>
      %40 = arith.select %38, %31, %39 : vector<8x8xi1>, vector<8x8xf32>
      %c0_17 = arith.constant 0 : index
      %c0_18 = arith.constant 0 : index
      %41 = vector.load %arg15[%c0_17, %c0_18] : memref<8x1xf32, #tpu.memory_space<vmem>>, vector<8x1xf32>
      %cst_19 = arith.constant dense<0xFF800000> : vector<8xf32>
      %42 = vector.multi_reduction <maximumf>, %40, %cst_19 [1] : vector<8x8xf32> to vector<8xf32>
      %43 = vector.shape_cast %42 : vector<8xf32> to vector<8x1xf32>
      %44 = arith.maximumf %41, %43 : vector<8x1xf32>
      %45 = arith.subf %41, %44 : vector<8x1xf32>
      %46 = math.exp %45 : vector<8x1xf32>
      %47 = vector.broadcast %44 : vector<8x1xf32> to vector<8x8xf32>
      %48 = arith.subf %40, %47 : vector<8x8xf32>
      %49 = math.exp %48 : vector<8x8xf32>
      %c0_20 = arith.constant 0 : index
      %c0_21 = arith.constant 0 : index
      %50 = vector.load %arg16[%c0_20, %c0_21] : memref<8x1xf32, #tpu.memory_space<vmem>>, vector<8x1xf32>
      %51 = arith.mulf %46, %50 : vector<8x1xf32>
      %cst_22 = arith.constant dense<0.000000e+00> : vector<8xf32>
      %52 = vector.multi_reduction <add>, %49, %cst_22 [1] : vector<8x8xf32> to vector<8xf32>
      %53 = vector.shape_cast %52 : vector<8xf32> to vector<8x1xf32>
      %54 = arith.addf %51, %53 : vector<8x1xf32>
      %c0_23 = arith.constant 0 : index
      %c0_24 = arith.constant 0 : index
      %55 = vector.load %arg16[%c0_23, %c0_24] : memref<8x1xf32, #tpu.memory_space<vmem>>, vector<8x1xf32>
      tpu.vector_store %arg16[%c0_23, %c0_24], %54 {strides = array<i32>} : memref<8x1xf32, #tpu.memory_space<vmem>>, vector<8x1xf32>,
      %c0_25 = arith.constant 0 : index
      %c0_26 = arith.constant 0 : index
      %56 = vector.load %arg17[%c0_25, %c0_26] : memref<8x16xf32, #tpu.memory_space<vmem>>, vector<8x16xf32>
      %57 = vector.broadcast %46 : vector<8x1xf32> to vector<8x16xf32>
      %58 = arith.mulf %57, %56 : vector<8x16xf32>
      %59 = arith.truncf %49 : vector<8x8xf32> to vector<8x8xbf16>
      %cst_27 = arith.constant dense<0.000000e+00> : vector<8x16xf32>
      %60 = tpu.matmul %59, %29, %cst_27 {dimension_numbers = #tpu.dot_dimension_numbers<[1], [0], [0], [1], [0, 0, 1, 1], [], []>} : vector<8x8xbf16>, vector<8x16xbf16>, vector<8x16xf32> -> vector<8x16xf32>
      %61 = arith.addf %58, %60 : vector<8x16xf32>
      %c0_28 = arith.constant 0 : index
      %c0_29 = arith.constant 0 : index
      %62 = vector.load %arg17[%c0_28, %c0_29] : memref<8x16xf32, #tpu.memory_space<vmem>>, vector<8x16xf32>
      tpu.vector_store %arg17[%c0_28, %c0_29], %61 {strides = array<i32>} : memref<8x16xf32, #tpu.memory_space<vmem>>, vector<8x16xf32>,
      %c0_30 = arith.constant 0 : index
      %c0_31 = arith.constant 0 : index
      %63 = vector.load %arg15[%c0_30, %c0_31] : memref<8x1xf32, #tpu.memory_space<vmem>>, vector<8x1xf32>
      tpu.vector_store %arg15[%c0_30, %c0_31], %44 {strides = array<i32>} : memref<8x1xf32, #tpu.memory_space<vmem>>, vector<8x1xf32>,
    } else {
    }
    %c0_i32_9 = arith.constant 0 : i32
    %21 = arith.cmpi eq, %arg2, %c0_i32_9 : i32
    %22 = arith.extui %21 : i1 to i32
    %c0_i32_10 = arith.constant 0 : i32
    %23 = arith.cmpi ne, %22, %c0_i32_10 : i32
    scf.if %23 {
      %c0 = arith.constant 0 : index
      %c0_11 = arith.constant 0 : index
      %24 = vector.load %arg17[%c0, %c0_11] : memref<8x16xf32, #tpu.memory_space<vmem>>, vector<8x16xf32>
      %c0_12 = arith.constant 0 : index
      %c0_13 = arith.constant 0 : index
      %25 = vector.load %arg16[%c0_12, %c0_13] : memref<8x1xf32, #tpu.memory_space<vmem>>, vector<8x1xf32>
      %26 = tpu.reciprocal %25 {approx = true} : vector<8x1xf32> -> vector<8x1xf32>
      %27 = vector.broadcast %26 : vector<8x1xf32> to vector<8x16xf32>
      %28 = arith.mulf %24, %27 : vector<8x16xf32>
      %c0_14 = arith.constant 0 : index
      %c0_15 = arith.constant 0 : index
      %c0_16 = arith.constant 0 : index
      %29 = vector.load %arg11[%c0_14, %c0_15, %c0_16] : memref<1x8x16xf32, #tpu.memory_space<vmem>>, vector<1x8x16xf32>
      %30 = vector.shape_cast %29 : vector<1x8x16xf32> to vector<8x16xf32>
      %31 = vector.shape_cast %28 : vector<8x16xf32> to vector<1x8x16xf32>
      tpu.vector_store %arg11[%c0_14, %c0_15, %c0_16], %31 {strides = array<i32>} : memref<1x8x16xf32, #tpu.memory_space<vmem>>, vector<1x8x16xf32>,
    } else {
    }
    return
  }
  func.func @transform_0(%arg0: i32, %arg1: i32, %arg2: i32) -> (i32, i32, i32) {
    %c0_i32 = arith.constant 0 : i32
    %c0_i32_0 = arith.constant 0 : i32
    return %arg0, %arg1, %c0_i32 : i32, i32, i32
  }
  func.func @transform_1(%arg0: i32, %arg1: i32, %arg2: i32) -> (i32, i32, i32) {
    %c0_i32 = arith.constant 0 : i32
    %0 = arith.cmpi eq, %arg1, %c0_i32 : i32
    %c0_i32_0 = arith.constant 0 : i32
    %1 = arith.select %0, %arg2, %c0_i32_0 : i32
    %c0_i32_1 = arith.constant 0 : i32
    %c0_i32_2 = arith.constant 0 : i32
    return %arg0, %1, %c0_i32_1 : i32, i32, i32
  }
  func.func @transform_2(%arg0: i32, %arg1: i32, %arg2: i32) -> (i32, i32) {
    %c0_i32 = arith.constant 0 : i32
    %c0_i32_0 = arith.constant 0 : i32
    %c0_i32_1 = arith.constant 0 : i32
    return %c0_i32, %c0_i32_0 : i32, i32
  }
  func.func @transform_3(%arg0: i32, %arg1: i32, %arg2: i32) -> (i32, i32) {
    %c0_i32 = arith.constant 0 : i32
    %c0_i32_0 = arith.constant 0 : i32
    %c0_i32_1 = arith.constant 0 : i32
    return %c0_i32, %c0_i32_0 : i32, i32
  }
  func.func @transform_4(%arg0: i32, %arg1: i32, %arg2: i32) -> (i32, i32) {
    %c0_i32 = arith.constant 0 : i32
    %c0_i32_0 = arith.constant 0 : i32
    %c0_i32_1 = arith.constant 0 : i32
    return %c0_i32, %c0_i32_0 : i32, i32
  }
  func.func @transform_5(%arg0: i32, %arg1: i32, %arg2: i32) -> (i32, i32) {
    %c0_i32 = arith.constant 0 : i32
    %c0_i32_0 = arith.constant 0 : i32
    %c0_i32_1 = arith.constant 0 : i32
    return %c0_i32, %c0_i32_0 : i32, i32
  }
  func.func @transform_6(%arg0: i32, %arg1: i32, %arg2: i32) -> (i32, i32) {
    %c0_i32 = arith.constant 0 : i32
    %c0_i32_0 = arith.constant 0 : i32
    %c0_i32_1 = arith.constant 0 : i32
    return %c0_i32, %c0_i32_0 : i32, i32
  }
  func.func @transform_7(%arg0: i32, %arg1: i32, %arg2: i32) -> (i32, i32) {
    %c0_i32 = arith.constant 0 : i32
    %c0_i32_0 = arith.constant 0 : i32
    %c0_i32_1 = arith.constant 0 : i32
    return %c0_i32, %c0_i32_0 : i32, i32
  }
  func.func @transform_8(%arg0: i32, %arg1: i32, %arg2: i32) -> (i32, i32, i32) {
    %c0_i32 = arith.constant 0 : i32
    %c0_i32_0 = arith.constant 0 : i32
    return %arg0, %arg1, %c0_i32 : i32, i32, i32
  }
}

</mosaic_0001>

<bundles_post_ra>
// kernel: tpu_custom_call.1
= control target key start
LH: loop header
LB: loop body
LE: loop exit
PB: predicated region body
PF: predicated region fallthrough
CT: control target
= control target key end

     0   :  { %13 = vsyncpa [#allocation9], 0  ;;  %s1489_s0 = inlined_call_operand.vmem [shape: bf16[2,8,32], index: 0, kind: input, shape index: {}]   ;;  %s1490_s1 = inlined_call_operand.vmem [shape: bf16[2,8,32], index: 1, kind: input, shape index: {}]   ;;  %s1491_s2 = inlined_call_operand.vmem [shape: bf16[32,16], index: 2, kind: input, shape index: {}]   ;;  %s1492_s3 = inlined_call_operand.vmem [shape: bf16[32,16], index: 3, kind: input, shape index: {}]   ;;  %s1493_s4 = inlined_call_operand.vmem [shape: bf16[32,16], index: 4, kind: input, shape index: {}]   ;;  %s1494_s5 = inlined_call_operand.vmem [shape: f32[1,16], index: 5, kind: input, shape index: {}]   ;;  %s1495_s6 = inlined_call_operand.vmem [shape: f32[1,16], index: 6, kind: input, shape index: {}]   ;;  %s1496_s7 = inlined_call_operand.vmem [shape: f32[1,16], index: 7, kind: input, shape index: {}]   ;;  %s1497_s8 = inlined_call_operand.hbm [shape: f32[2,8,16], index: 8, kind: output, shape index: {}]  }
   0x1   :  { %15 = vsyncpa [#allocation9 + $0x1], 0  ;;  %s1309_s27 = smov 0   ;;  %s1311_s28 = smov 0  }
   0x2   :  { %s1313_s29 = smov 0   ;;  %s1315_s30 = smov 0  }
   0x3   :  { %s1317_s9 = smov 0   ;;  %s1319_s10 = smov 0  }
   0x4 LB: > { %s1029_s11 = sadd.s32 4294967295, %s1257_s10   ;;  %s1030_s12 = sadd.s32 4294967294, %s1257_s10   ;;  %s1257_s10 = sphi %s1319_s10, %s21_s10   ;;  %s1253_s9 = sphi %s1317_s9, %s1504_s9   ;;  %s1249_s30 = sphi %s1315_s30, %s1503_s30   ;;  %s1245_s29 = sphi %s1313_s29, %s1502_s29   ;;  %s1241_s28 = sphi %s1311_s28, %s1501_s28   ;;  %s1237_s27 = sphi %s1309_s27, %s1500_s27  }
   0x5   : > { %s40_s13 = sadd.s32 1, %s1253_s9  ;;  %s235_s14 = sadd.s32 1, %s1245_s29 }
   0x6   : > { %p42_p0 = scmp.ge.s32.totalorder %s40_s13, 2  ;;  %p245_p1 = scmp.ne.s32.totalorder %s1245_s29, %s1241_s28 }
   0x7   : > { %p246_p2 = scmp.eq.s32.totalorder %s1029_s11, 1  ;;  %p251_p3 = scmp.ne.s32.totalorder %s1241_s28, %s1237_s27 }
   0x8   : > { %s1506_s13 = smov (%p42_p0, %s40_s13), 0  ;;  %p252_p5 = scmp.eq.s32.totalorder %s1030_s12, 1 }
   0x9   : > { %p1349_p4 = por %p246_p2, %p245_p1  ;;  %s230_s16 = ssub.s32 %s1253_s9, %s1506_s13 }
   0xa   : > { %p1033_p6 = scmp.ge.s32.totalorder %s1257_s10, 1  ;;  %p233_p7 = scmp.eq.s32.totalorder %s230_s16, 0 }
   0xb   : > { %p1356_p8 = por %p252_p5, %p251_p3  ;;  %p312_p9 = scmp.lt.s32.totalorder %s1257_s10, 3 }
   0xc   : > { %s1362_s18 = scalar_select %p233_p7, %s1245_s29, %s235_s14  }
   0xd   : > { %p313_p10 = pnand %p1033_p6, %p312_p9 }
   0xe   : > { %v1167_v0 = vld [vmem:[%s1492_s3] sm:$0xff] (!%p313_p10)   ;;  %v1259_v1 = vmov (!%p313_p10), 0.0   ;;  %v1168_v2 = vld [vmem:[%s1492_s3 + $0x8] sm:$0xff] (!%p313_p10)   ;;  %vm1260_vm0 = vmmov (!%p313_p10), 0   ;;  %p357_p11 = scmp.lt.s32.totalorder (!%p313_p10), %s1249_s30, 1  ;;  %vm406_vm1 = vcmask (!%p313_p10), 261120   ;;  %v807_v37 = vlaneseq (!%p313_p10) }
   0xf   : > { %316 = sbr.rel (%p313_p10) target bundleno = 1070 (0x42e), region = 52  ;;  %1070 = vmatprep.subr.bf16.mxu0 (!%p313_p10), %v1259_v1  ;;  %1078 = vmatprep.subr.bf16.mxu1 (!%p313_p10), %v1259_v1  ;;  %v1169_v3 = vld [vmem:[%s1491_s2] sm:$0xff] (!%p313_p10)   ;;  %v1170_v5 = vld [vmem:[%s1491_s2 + $0x8] sm:$0xff] (!%p313_p10)   ;;  %vm601_vm2 = vcmask (!%p313_p10), 130048   ;;  %vm516_vm3 = vcmask (!%p313_p10), 125952   ;;  %vm852_vm4 = vcmask (!%p313_p10), 1043456  }
  0x10   : > { %1071 = vmatpush3.bf16.msra.mxu0 (!%p313_p10), %v1167_v0  ;;  %1074 = vmatprep.mubr.msk.bf16.mxu0 (!%p313_p10), %vm1260_vm0, %v1259_v1  ;;  %v1171_v7 = vld [vmem:[%s1493_s4] sm:$0xff] (!%p313_p10)   ;;  %v1172_v8 = vld [vmem:[%s1493_s4 + $0x8] sm:$0xff] (!%p313_p10)   ;;  %602 = vst.msk [vmem:[#allocation7] sm:$0xff] (!%p313_p10), %vm601_vm2, %v1259_v1  ;;  %vm598_vm5 = vcmask (!%p313_p10), 7168   ;;  %v1261_v36 = vmov (!%p313_p10), -inf   ;;  %v808_v38 = vand.u32 (!%p313_p10), 127, %v807_v37 }
  0x11   : > { %1072 = vmatprep.subr.bf16.mxu0 (!%p313_p10), %v1259_v1  ;;  %1082 = vmatprep.mubr.msk.bf16.mxu1 (!%p313_p10), %vm1260_vm0, %v1259_v1  ;;  %v1037_v9 = vld [vmem:[%s1495_s6] ss:$0 sm:$0xff] (!%p313_p10)  ;;  %599 = vst.msk [vmem:[#allocation5] sm:$0xff] (!%p313_p10), %vm598_vm5, %v1261_v36  ;;  %600 = vst.msk [vmem:[#allocation6] sm:$0xff] (!%p313_p10), %vm598_vm5, %v1259_v1  ;;  %v811_v39 = vshrl.u32 (!%p313_p10), %v807_v37, 7  ;;  %vm817_vm7 = vcmask (!%p313_p10), 64512  }
  0x12   : > { %1079 = vmatpush3.bf16.msra.mxu1 (!%p313_p10), %v1171_v7  ;;  %v1045_v16 = vld [vmem:[%s1494_s5] ss:$0 sm:$0xff] (!%p313_p10)  ;;  %v1262_v46 = vmov (!%p313_p10), 0   ;;  %s354_s21 = sand.u32 (!%p313_p10), 1, %s1241_s28  }
  0x13   : > { %1080 = vmatprep.subr.bf16.mxu1 (!%p313_p10), %v1259_v1  ;;  %v1041_v27 = vld [vmem:[%s1496_s7] ss:$0 sm:$0xff] (!%p313_p10)  ;;  %vm814_vm6 = vcmp.le.s32.totalorder (!%p313_p10), %v808_v38, %v811_v39  ;;  %1165 = vset.pattern.permute.xlu0 (!%p313_p10), %v1262_v46 }
  0x14   : > { %1073 = vmatpush3.bf16.msra.mxu0 (!%p313_p10), %v1168_v2  ;;  %1166 = vset.pattern.permute.xlu1 (!%p313_p10), %v1262_v46 }
  0x15   : > { %1086 = vmatprep.subr.bf16.mxu0 (!%p313_p10), %v1259_v1 }
  0x16   : > { %s358_s23 = scalar_select %p357_p11, %s1249_s30, 1  ;;  %1081 = vmatpush3.bf16.msra.mxu1 %v1172_v8 }
  0x17   : > { %1094 = vmatprep.subr.bf16.mxu1 %v1259_v1 }
  0x18   : > { %s1035_s24 = sshll.u32 %s358_s23, 2  ;;  %v816_v47 = vld [vmem:[#allocation5] sm:$0xff]  ;;  %v833_v59 = vld [vmem:[#allocation6] sm:$0xff]  ;;  %s1054_s23 = sshll.u32 %s1249_s30, 7 }
  0x19   : > { %s372_s14 = scalar_lea.vmem %s1490_s1, %s1035_s24  ;;  %s363_s22 = scalar_lea.vmem %s1489_s0, %s1035_s24 }
  0x1a   : > { %v382_v4 = vld [vmem:[%s372_s14] sm:$0xf]  ;;  %s1441_s12 = scalar_lea.hbm %s1497_s8, %s1054_s23  ;;  %s914_s14 = scalar_lea.sflag [#allocation9], %s354_s21 }
  0x1b   : > { %1075 = vmatmul.mubr.msk.bf16.vlgmr.msra.gmra.mrb[0].mxu0 %vm406_vm1, %v382_v4  ;;  %v526_v6 = vld [vmem:[%s363_s22] sm:$0xf]  ;;  %1083 = vmatmul.mubr.msk.bf16.vlgmr.msra.gmra.mrb[0].mxu1 %vm406_vm1, %v382_v4  ;;  %s1034_s22 = sshll.u32 %s354_s21, 3  ;;  %s1263_s30 = smov [#allocation8]  }
  0x1c   : > { %1087 = vmatpush3.bf16.msra.mxu0 %v1169_v3  ;;  %1090 = vmatprep.mubr.msk.bf16.mxu0 %vm1260_vm0, %v1259_v1  ;;  %s356_s25 = scalar_lea.vmem [#allocation8], %s1034_s22  ;;  %s1183_s19 = sshll.u32 %s1263_s30, 4  ;;  %s1184_s19 = int_to_ptr.vmem [resolvable:$false] %s1183_s19 }
  0x1d   : > { %1088 = vmatprep.subr.bf16.mxu0 %v1259_v1  ;;  %1096 = vmatprep.mubr.msk.bf16.mxu1 %vm1260_vm0, %v1259_v1  ;;  %s928_s26 = sshll.u32 %s356_s25, 4  ;;  %s1185_s20 = scalar_lea.vmem %s1184_s19, 256  ;;  %s1443_s26 = int_to_ptr.vmem [resolvable:$true] %s928_s26 }
  0x1e   : > { %s1179_s16 = scalar_lea.vmem %s1443_s26, 128  ;;  %p1186_p1 = scmp.lt.s32.totalorder %s1443_s26, %s1184_s19 }
  0x1f   : > { %p1180_p12 = scmp.ne.s32.totalorder %s1443_s26, %s1179_s16  ;;  %p1187_p2 = scmp.lt.s32.totalorder %s1185_s20, %s1179_s16 }
  0x20   : > { %1089 = vmatpush3.bf16.msra.mxu0 %v1170_v5 }
  0x21   : > { %1100 = vmatprep.subr.bf16.mxu0 %v1259_v1  ;;  %p1181_p13 = pnand %p1180_p12, %p1349_p4  ;;  %p1188_p3 = por %p1187_p2, %p1186_p1 }
  0x23   : > { %1091 = vmatmul.mubr.msk.bf16.vlgmr.msra.gmra.mrb[4].mxu0 %vm406_vm1, %v526_v6  ;;  %p1182_p0 = pneg %p1181_p13 }
  0x24   : > { %1102 = vmatprep.mubr.msk.bf16.mxu0 %vm1260_vm0, %v1259_v1  ;;  %v841_v1 = vld [vmem:[#allocation7] sm:$0xff] }
  0x25   : > { %p1189_p5 = pnand %p1188_p3, %p1182_p0 }
  0xee   : > { %v444_v10 = vpop.f32.mrb[0].mxu0  ;;  %v507_v28 = vpop.f32.mrb[0].mxu1 }
  0xef   : > { %v445_v11 = vadd.f32 %v1037_v9, %v444_v10  ;;  %v1076_v12 = vpop.f32.mrb[1].mxu0  ;;  %v508_v29 = vadd.f32 %v1041_v27, %v507_v28  ;;  %v1084_v30 = vpop.f32.mrb[1].mxu1 }
  0xf0   : > { %v447_v13 = vpop.f32.mrb[2].mxu0  ;;  %v510_v31 = vpop.f32.mrb[2].mxu1 }
  0xf1   : > { %v513_v14 = vpack.c.bf16 %v445_v11, %v445_v11  ;;  %v1077_v15 = vpop.f32.mrb[3].mxu0  ;;  %v518_v32 = vpack.c.bf16 %v508_v29, %v508_v29  ;;  %v1085_v33 = vpop.f32.mrb[3].mxu1 }
  0xf3   : > { %517 = vst.msk [vmem:[#allocation2] sm:$0xf] %vm516_vm3, %v513_v14  ;;  %521 = vst.msk [vmem:[#allocation3] sm:$0xf] %vm516_vm3, %v518_v32 }
  0xf6   : > { %v588_v17 = vpop.f32.mrb[4].mxu0 }
  0xf7   : > { %v589_v18 = vadd.f32 %v1045_v16, %v588_v17  ;;  %v1092_v19 = vpop.f32.mrb[5].mxu0 }
  0xf8   : > { %v591_v20 = vpop.f32.mrb[6].mxu0 }
  0xf9   : > { %v594_v21 = vmul.f32 0.25, %v589_v18  ;;  %v1093_v22 = vpop.f32.mrb[7].mxu0 }
  0xfa   : > { %v755_v23 = vld [vmem:[#allocation2] sm:$0xf]  ;;  %v758_v34 = vld [vmem:[#allocation3] sm:$0xf] }
  0xfb   : > { %v595_v24 = vpack.c.bf16 %v594_v21, %v594_v21  ;;  %v765_v25 = vsel %vm601_vm2, %v755_v23, 0  ;;  %v854_v35 = vsel %vm852_vm4, %v758_v34, 0 }
  0xfc   : > { %1095 = vmatpush3.bf16.xpose.msra.mxu1 %v765_v25  ;;  %1101 = vmatpush3.bf16.msra.mxu0 %v854_v35 }
  0xfd   : > { %597 = vst.msk [vmem:[#allocation4] sm:$0xf] %vm516_vm3, %v595_v24 }
 0x104   : > { %v759_v26 = vld [vmem:[#allocation4] sm:$0xf] }
 0x105   : > { %1097 = vmatmul.mubr.msk.bf16.vlgmr.msra.gmra.mrb[4].mxu1 %vm601_vm2, %v759_v26 }
 0x1d8   : > { %v801_v40 = vpop.f32.mrb[4].mxu1 }
 0x1d9   : > { %v815_v41 = vsel %vm814_vm6, %v801_v40, -inf  ;;  %v1098_v42 = vpop.f32.mrb[5].mxu1 }
 0x1da   : > { %v804_v43 = vpop.f32.mrb[6].mxu1  ;;  %v818_v44 = vsel %vm817_vm7, %v815_v41, -inf }
 0x1db   : > { %819 = vmax.xlane.f32.xlu0 %v818_v44  ;;  %v1099_v45 = vpop.f32.mrb[7].mxu1 }
 0x268   : > { %v820_v48 = vpop.xlane.xlu0 %819 }
 0x269   : > { %v821_v49 = vmax.f32 %v816_v47, %v820_v48 }
 0x26b   : > { %v822_v50 = vsub.f32 %v816_v47, %v821_v49  ;;  %898 = vst.msk [vmem:[#allocation5] sm:$0xff] %vm598_vm5, %v821_v49  ;;  %827 = vperm.xlu0 %1165, %v821_v49  }
 0x26d   : > { %v823_v57 = vmul.f32 1.442695, %v822_v50 }
 0x2ea   : > { %v828_v51 = vpop.permute.xlu0 %827 }
 0x2eb   : > { %v830_v52 = vsub.f32 %v815_v41, %v828_v51 }
 0x2ed   : > { %v831_v53 = vmul.f32 1.442695, %v830_v52 }
 0x2ef   : > { %1173 = vpow2.f32 %v831_v53 }
 0x2f0   : > { %1175 = vpow2.f32 %v823_v57 }
 0x2f9   : > { %v1174_v54 = vpop.eup %1173 }
 0x2fa   : > { %v835_v55 = vsel %vm817_vm7, %v1174_v54, 0.0  ;;  %v848_v56 = vpack.c.bf16 %v1174_v54, %v1174_v54  ;;  %v1176_v58 = vpop.eup %1175 }
 0x2fb   : > { %836 = vadd.xlane.f32.xlu1 %v835_v55  ;;  %v834_v60 = vmul.f32 %v1176_v58, %v833_v59 }
 0x2fc   : > { %1103 = vmatmul.mubr.msk.bf16.vlgmr.msra.gmra.mrb[8].mxu0 %vm817_vm7, %v848_v56 }
 0x30c   : > { %844 = vperm.xlu1 %1166, %v1176_v58  }
 0x388   : > { %v837_v61 = vpop.xlane.xlu1 %836 }
 0x389   : > { %v838_v62 = vadd.f32 %v837_v61, %v834_v60 }
 0x38b   : > { %840 = vst.msk [vmem:[#allocation6] sm:$0xff] %vm598_vm5, %v838_v62 }
 0x38c   : > { %v845_v2 = vpop.permute.xlu1 %844 }
 0x38d   : > { %v847_v3 = vmul.f32 %v845_v2, %v841_v1 }
 0x392   : > { %v903_v63 = vld [vmem:[#allocation6] sm:$0xff] }
 0x393   : > { %1177 = vrcp.f32 %v903_v63 }
 0x39d   : > { %v1178_v0 = vpop.eup %1177 }
 0x39e   : > { %907 = vperm.xlu1 %1166, %v1178_v0  }
 0x3cf   : > { %v890_v4 = vpop.f32.mrb[8].mxu0 }
 0x3d0   : > { %v896_v5 = vadd.f32 %v890_v4, %v847_v3  ;;  %v1104_v6 = vpop.f32.mrb[9].mxu0 }
 0x3d1   : > { %v893_v7 = vpop.f32.mrb[10].mxu0 }
 0x3d2   : > { %897 = vst.msk [vmem:[#allocation7] sm:$0xff] %vm601_vm2, %v896_v5  ;;  %v1105_v8 = vpop.f32.mrb[11].mxu0 }
 0x3d9   : > { %v902_v10 = vld [vmem:[#allocation7] sm:$0xff] }
 0x41d   : > { %v908_v9 = vpop.permute.xlu1 %907 }
 0x41e   : > { %v910_v11 = vmul.f32 %v908_v9, %v902_v10 }
 0x420   : > { %912 = vst.msk [vmem:[%s356_s25] sm:$0xff] %vm601_vm2, %v910_v11 }
 0x421   : > { %1192 = shalt.err (!%p1189_p5)
}
 0x422   : > { %s1193_s21 = scalar_lea.hbm %s1441_s12, 128  ;;  %s1197_s25 = scalar_lea.hbm %s1497_s8, 256 }
 0x423   : > { %p1194_p6 = scmp.ne.s32.totalorder %s1441_s12, %s1193_s21  ;;  %p1198_p10 = scmp.lt.u32.totalorder %s1441_s12, %s1497_s8 }
 0x424   : > { %p1199_p11 = scmp.lt.u32.totalorder %s1197_s25, %s1193_s21  ;;  %p1201_p13 = scmp.lt.u32.totalorder %s1193_s21, %s1441_s12 }
 0x425   : > { %p1195_p7 = pnand %p1194_p6, %p1349_p4 }
 0x426   : > { %p1200_p12 = por %p1199_p11, %p1198_p10 }
 0x427   : > { %p1196_p9 = pneg %p1195_p7 }
 0x428   : > { %p1202_p0 = por %p1201_p13, %p1200_p12 }
 0x42a   : > { %p1203_p1 = pnand %p1202_p0, %p1196_p9 }
 0x42c   : > { %1206 = shalt.err (!%p1203_p1)
}
 0x42d   : > { %1106 = dma.vmem_to_hbm [thread:$0]  (%p1349_p4), %s1443_s26, 128, %s1441_s12, %s914_s14  }
 0x42e PF: > { %p1112_p2 = scmp.ge.s32.totalorder %s1257_s10, 2  ;;  %s940_s16 = sand.u32 1, %s1237_s27  }
 0x42f   : > { %s941_s30 = scalar_lea.sflag [#allocation9], %s940_s16 }
 0x430   : > { %p1109_p3 = pnand %p1112_p2, %p1356_p8 }
 0x432   : > { %1232 = dma.done.wait (!%p1109_p3), %s941_s30, 128  }
 0x433   : > { %1234 = vsyncadd (!%p1109_p3), %s941_s30, 4294967168  ;;  %s21_s10 = sadd.s32 1, %s1257_s10   ;;  %s1500_s27 = smov %s1241_s28 }
 0x434   : > { %p18_p5 = scmp.ge.s32.totalorder %s21_s10, 4   ;;  %s1501_s28 = smov %s1245_s29 }
 0x435   : > { %s1502_s29 = smov %s1362_s18  ;;  %s1503_s30 = smov %s1253_s9 }
 0x436   : > { %s1504_s9 = smov %s1506_s13  ;;  %20 = sbr.rel (!%p18_p5) target bundleno = 4 (0x4), region = 116 }
 0x43d   :  { %946 = vsyncpa [#allocation9], 1 }
 0x43e   :  { %948 = vsyncpa [#allocation9 + $0x1], 1 }

</bundles_post_ra>
